<compile_context>
chip_gen: v7x
topology: tpu7x:2x2x1
jax: 0.10.0
libtpu: 0.0.40
codegen_flags: <defaults>
</compile_context>

<pallas_src>
import functools

import jax
import jax.numpy as jnp
from jax.experimental import pallas as pl
from jax.experimental.pallas import tpu as pltpu

_LANE = 128
_SUBLANE = 8


def _round_up(n: int, m: int) -> int:
    return ((n + m - 1) // m) * m


def _pad2(a, rows: int, cols: int):
    r, c = a.shape
    if r == rows and c == cols:
        return a
    return jnp.pad(a, ((0, rows - r), (0, cols - c)))


# --------------------------------------------------------------------------
# Kernel body
# --------------------------------------------------------------------------
def _make_kernel(use_d1: bool, use_d2: bool):
    """Fused MLP body. Dropout (if active) is a pure mask-select: the 1/(1-p)
    scale was folded into w2/w3 at prep time."""

    def kernel(*refs):
        x_ref, w1_ref, b1_ref, w2_ref, b2_ref, w3_ref, b3_ref = refs[:7]
        rest = list(refs[7:])
        o_ref = rest.pop()                      # output ref is last
        m1_ref = rest.pop(0) if use_d1 else None
        m2_ref = rest.pop(0) if use_d2 else None

        x = x_ref[...]

        # layer 1: Linear + ReLU (+ dropout mask), f32 accumulate / epilogue
        h1 = jnp.dot(x, w1_ref[...], preferred_element_type=jnp.float32)
        h1 = jnp.maximum(h1 + b1_ref[...], 0.0)
        if use_d1:
            h1 = jnp.where(m1_ref[...] != 0, h1, 0.0)

        # layer 2: Linear + ReLU (+ dropout mask)
        h2 = jnp.dot(h1.astype(w2_ref.dtype), w2_ref[...],
                     preferred_element_type=jnp.float32)
        h2 = jnp.maximum(h2 + b2_ref[...], 0.0)
        if use_d2:
            h2 = jnp.where(m2_ref[...] != 0, h2, 0.0)

        # layer 3: Linear (no activation)
        o = jnp.dot(h2.astype(w3_ref.dtype), w3_ref[...],
                    preferred_element_type=jnp.float32)
        o_ref[...] = (o + b3_ref[...]).astype(o_ref.dtype)

    return kernel


# --------------------------------------------------------------------------
# Parameter / mask preparation (done ONCE, outside the per-call forward)
# --------------------------------------------------------------------------
def prepare_params(params, *, p1, p2, training, matmul_dtype=jnp.bfloat16):
    """Pad feature dims to lane (128) multiples, fold the inverted-dropout
    1/(1-p) scales into the downstream weights, and cast matmul operands to
    `matmul_dtype` once.  Biases stay f32 (f32 epilogue)."""
    w1, b1 = params["w1"], params["b1"]
    w2, b2 = params["w2"], params["b2"]
    w3, b3 = params["w3"], params["b3"]
    n_in, h1 = w1.shape
    h2, n_out = w3.shape[0], w3.shape[1]
    h1p, h2p, n_outp = (_round_up(d, _LANE) for d in (h1, h2, n_out))

    # Fold dropout scale into the next layer's weights (compile-time const).
    if training and p1 > 0.0:
        w2 = w2 * (1.0 / (1.0 - p1))
    if training and p2 > 0.0:
        w3 = w3 * (1.0 / (1.0 - p2))

    dt = matmul_dtype
    return {
        "w1": _pad2(w1, n_in, h1p).astype(dt),
        "b1": _pad2(b1, 1, h1p).astype(jnp.float32),
        "w2": _pad2(w2, h1p, h2p).astype(dt),
        "b2": _pad2(b2, 1, h2p).astype(jnp.float32),
        "w3": _pad2(w3, h2p, n_outp).astype(dt),
        "b3": _pad2(b3, 1, n_outp).astype(jnp.float32),
    }


def make_dropout_masks(key, batch, h1, h2, p1, p2):
    """Host-side pre-thresholded uint8 keep-masks (1=keep, 0=drop).
    4x less HBM traffic than streaming f32 uniforms and bit-identical to the
    pure-JAX reference's mask construction."""
    k1, k2 = jax.random.split(key)
    m1 = m2 = None
    if p1 > 0.0:
        m1 = (jax.random.uniform(k1, (batch, h1), jnp.float32) >= p1).astype(jnp.uint8)
    if p2 > 0.0:
        m2 = (jax.random.uniform(k2, (batch, h2), jnp.float32) >= p2).astype(jnp.uint8)
    return m1, m2


# --------------------------------------------------------------------------
# Forward
# --------------------------------------------------------------------------
@functools.partial(jax.jit, static_argnames=("n_out", "block_b"))
def mlpdr2_forward(x, prepped, mask1=None, mask2=None, *, n_out, block_b=None):
    """x: [B, n_input].  prepped: output of prepare_params.  mask1/mask2:
    optional uint8 keep-masks ([B, h1]/[B, h2]) for training-mode dropout."""
    w1, b1 = prepped["w1"], prepped["b1"]
    w2, b2 = prepped["w2"], prepped["b2"]
    w3, b3 = prepped["w3"], prepped["b3"]
    B, n_in = x.shape
    h1p, h2p, n_outp = w1.shape[1], w2.shape[1], w3.shape[1]
    use_d1 = mask1 is not None
    use_d2 = mask2 is not None

    # Cast the streamed activation once to the matmul dtype (halves x DMA
    # when the weights are bf16).
    if x.dtype != w1.dtype:
        x = x.astype(w1.dtype)
    w_bytes = jnp.dtype(w1.dtype).itemsize
    x_bytes = jnp.dtype(x.dtype).itemsize

    # ---- batch-tile selection ------------------------------------------
    # Always produce >= 2 grid steps for small B so v7x's two TensorCores both
    # get work; align rows to the sublane packing of the matmul dtype; cap at
    # 512-row tiles for large B; shrink until the VMEM budget fits.
    row_align = _SUBLANE if x_bytes >= 4 else 2 * _SUBLANE
    if block_b is None:
        if B <= 1024:
            align = row_align if B >= 2 * row_align else _SUBLANE
            block_b = max(align, _round_up(pl.cdiv(B, 2), align))
        else:
            block_b = 512

    def vmem_estimate(bb):
        # weights/biases single-buffered (pl.Buffered(1)), per-step tiles x2.
        weights = ((n_in * h1p + h1p * h2p + h2p * n_outp) * w_bytes
                   + (h1p + h2p + n_outp) * 4)
        per_step = bb * (n_in * x_bytes + n_outp * 4)
        if use_d1:
            per_step += bb * h1p
        if use_d2:
            per_step += bb * h2p
        return weights + 2 * per_step

    _VMEM_BUDGET = 48 << 20          # headroom under v7x's 64 MiB physical
    while block_b > _SUBLANE and vmem_estimate(block_b) > _VMEM_BUDGET:
        block_b = max(_SUBLANE, _round_up(block_b // 2, _SUBLANE))

    B_pad = _round_up(B, block_b)
    grid = (B_pad // block_b,)

    # ---- pad batch / masks to the tiled shapes --------------------------
    if B_pad != B:
        x = jnp.pad(x, ((0, B_pad - B), (0, 0)))
    if use_d1:
        mask1 = jnp.pad(mask1, ((0, B_pad - mask1.shape[0]),
                                (0, h1p - mask1.shape[1])))
    if use_d2:
        mask2 = jnp.pad(mask2, ((0, B_pad - mask2.shape[0]),
                                (0, h2p - mask2.shape[1])))

    # ---- BlockSpecs ------------------------------------------------------
    const = pl.Buffered(1)   # grid-invariant operands: single VMEM buffer
    inputs = [x, w1, b1, w2, b2, w3, b3]
    in_specs = [
        pl.BlockSpec((block_b, n_in), lambda i: (i, 0)),                      # x tile
        pl.BlockSpec((n_in, h1p),   lambda i: (0, 0), pipeline_mode=const),   # w1
        pl.BlockSpec((1, h1p),      lambda i: (0, 0), pipeline_mode=const),   # b1
        pl.BlockSpec((h1p, h2p),    lambda i: (0, 0), pipeline_mode=const),   # w2
        pl.BlockSpec((1, h2p),      lambda i: (0, 0), pipeline_mode=const),   # b2
        pl.BlockSpec((h2p, n_outp), lambda i: (0, 0), pipeline_mode=const),   # w3
        pl.BlockSpec((1, n_outp),   lambda i: (0, 0), pipeline_mode=const),   # b3
    ]
    if use_d1:
        inputs.append(mask1)
        in_specs.append(pl.BlockSpec((block_b, h1p), lambda i: (i, 0)))
    if use_d2:
        inputs.append(mask2)
        in_specs.append(pl.BlockSpec((block_b, h2p), lambda i: (i, 0)))

    flops = 2 * B_pad * (n_in * h1p + h1p * h2p + h2p * n_outp)
    bytes_accessed = int(
        sum(a.size * jnp.dtype(a.dtype).itemsize for a in inputs)
        + B_pad * n_outp * 4)

    out_padded = pl.pallas_call(
        _make_kernel(use_d1, use_d2),
        out_shape=jax.ShapeDtypeStruct((B_pad, n_outp), jnp.float32),
        grid_spec=pltpu.PrefetchScalarGridSpec(
            num_scalar_prefetch=0,
            grid=grid,
            in_specs=in_specs,
            out_specs=pl.BlockSpec((block_b, n_outp), lambda i: (i, 0)),
        ),
        compiler_params=pltpu.CompilerParams(
            dimension_semantics=("parallel",),            # batch tiles independent
            vmem_limit_bytes=int(min(64 << 20,
                                     max(32 << 20, 2 * vmem_estimate(block_b)))),
        ),
        cost_estimate=pl.CostEstimate(flops=flops, transcendentals=0,
                                      bytes_accessed=bytes_accessed),
    )(*inputs)

    return out_padded[:B, :n_out]


# --------------------------------------------------------------------------
# Init + pure-JAX reference
# --------------------------------------------------------------------------
def init_params(key, n_input, n_hidden1, n_hidden2, n_output):
    """Xavier-normal weights (stored transposed: [in, out]) + torch-style bias."""
    def xavier(k, fan_in, fan_out):
        std = (2.0 / (fan_in + fan_out)) ** 0.5
        return std * jax.random.normal(k, (fan_in, fan_out), jnp.float32)

    def bias(k, fan_in, fan_out):
        bound = 1.0 / (fan_in ** 0.5)     # PyTorch default Linear bias init
        return jax.random.uniform(k, (1, fan_out), jnp.float32, -bound, bound)

    ks = jax.random.split(key, 6)
    return {
        "w1": xavier(ks[0], n_input, n_hidden1),
        "b1": bias(ks[1], n_input, n_hidden1),
        "w2": xavier(ks[2], n_hidden1, n_hidden2),
        "b2": bias(ks[3], n_hidden1, n_hidden2),
        "w3": xavier(ks[4], n_hidden2, n_output),
        "b3": bias(ks[5], n_hidden2, n_output),
    }


def reference_forward(x, params, key=None, *, p1=0.0, p2=0.0, training=False):
    """Pure-JAX reference with standard inverted dropout (same mask stream)."""
    inv_keep1 = 1.0 / (1.0 - p1) if p1 < 1.0 else 0.0
    inv_keep2 = 1.0 / (1.0 - p2) if p2 < 1.0 else 0.0
    if training:
        k1, k2 = jax.random.split(key)
    h1 = jnp.maximum(x @ params["w1"] + params["b1"], 0.0)
    if training and p1 > 0.0:
        u1 = jax.random.uniform(k1, h1.shape, jnp.float32)
        h1 = jnp.where(u1 >= p1, h1 * inv_keep1, 0.0)
    h2 = jnp.maximum(h1 @ params["w2"] + params["b2"], 0.0)
    if training and p2 > 0.0:
        u2 = jax.random.uniform(k2, h2.shape, jnp.float32)
        h2 = jnp.where(u2 >= p2, h2 * inv_keep2, 0.0)
    return h2 @ params["w3"] + params["b3"]


if __name__ == "__main__":
    # Small shapes consistent with the module.
    B, n_input, n_hidden1, n_hidden2, n_output = 16, 32, 64, 32, 16
    p_dropout1, p_dropout2 = 0.25, 0.5

    root = jax.random.PRNGKey(0)
    k_x, k_p, k_drop = jax.random.split(root, 3)
    x = jax.random.normal(k_x, (B, n_input), jnp.float32)
    params = init_params(k_p, n_input, n_hidden1, n_hidden2, n_output)

    # ---- eval mode, f32 matmul path (exact check vs pure-JAX reference) ----
    prepped_eval_f32 = prepare_params(params, p1=p_dropout1, p2=p_dropout2,
                                      training=False, matmul_dtype=jnp.float32)
    out_eval = mlpdr2_forward(x, prepped_eval_f32, n_out=n_output)
    out_eval = jax.block_until_ready(out_eval)
    ref_eval = reference_forward(x, params, training=False)
    assert out_eval.shape == (B, n_output)
    assert jnp.allclose(out_eval, ref_eval, atol=1e-5, rtol=1e-5), "eval mismatch"

    # ---- training mode, f32 matmuls, streamed uint8 keep-masks -------------
    # TODO(synk): masks come from jax.random (Bernoulli keep, 1/(1-p) scale
    # folded into w2/w3); they cannot bit-match torch's RNG stream, only its
    # distribution.
    mask1, mask2 = make_dropout_masks(k_drop, B, n_hidden1, n_hidden2,
                                      p_dropout1, p_dropout2)
    prepped_train_f32 = prepare_params(params, p1=p_dropout1, p2=p_dropout2,
                                       training=True, matmul_dtype=jnp.float32)
    out_train = mlpdr2_forward(x, prepped_train_f32, mask1, mask2, n_out=n_output)
    out_train = jax.block_until_ready(out_train)
    ref_train = reference_forward(x, params, k_drop, p1=p_dropout1,
                                  p2=p_dropout2, training=True)
    assert jnp.allclose(out_train, ref_train, atol=1e-4, rtol=1e-4), \
        "train mismatch"

    # ---- default bf16 matmul path (f32 accumulate), eval — loose check -----
    prepped_eval_bf16 = prepare_params(params, p1=p_dropout1, p2=p_dropout2,
                                       training=False)    # bf16 by default
    out_bf16 = mlpdr2_forward(x, prepped_eval_bf16, n_out=n_output)
    out_bf16 = jax.block_until_ready(out_bf16)
    assert jnp.max(jnp.abs(out_bf16 - ref_eval)) < 0.1, "bf16 path diverged"

    print("KERNEL_OK")
</pallas_src>

<mosaic_0001>
module attributes {stable_mosaic.version = 11 : i64} {
  func.func @kernel(%arg0: i32, %arg1: memref<8x32xf32, #tpu.memory_space<vmem>>, %arg2: memref<32x128xf32, #tpu.memory_space<vmem>>, %arg3: memref<1x128xf32, #tpu.memory_space<vmem>>, %arg4: memref<128x128xf32, #tpu.memory_space<vmem>>, %arg5: memref<1x128xf32, #tpu.memory_space<vmem>>, %arg6: memref<128x128xf32, #tpu.memory_space<vmem>>, %arg7: memref<1x128xf32, #tpu.memory_space<vmem>>, %arg8: memref<8x128xf32, #tpu.memory_space<vmem>>) attributes {dimension_semantics = [#tpu.dimension_semantics<parallel>], iteration_bounds = array<i64: 2>, scalar_prefetch = 0 : i64, scratch_operands = 0 : i64, tpu.core_type = #tpu.core_type<tc>, window_params = [{transform_indices = @transform_0, window_bounds = array<i64: 8, 32>}, {pipeline_mode = #tpu.pipeline_mode<synchronous>, transform_indices = @transform_1, window_bounds = array<i64: 32, 128>}, {pipeline_mode = #tpu.pipeline_mode<synchronous>, transform_indices = @transform_2, window_bounds = array<i64: 1, 128>}, {pipeline_mode = #tpu.pipeline_mode<synchronous>, transform_indices = @transform_3, window_bounds = array<i64: 128, 128>}, {pipeline_mode = #tpu.pipeline_mode<synchronous>, transform_indices = @transform_4, window_bounds = array<i64: 1, 128>}, {pipeline_mode = #tpu.pipeline_mode<synchronous>, transform_indices = @transform_5, window_bounds = array<i64: 128, 128>}, {pipeline_mode = #tpu.pipeline_mode<synchronous>, transform_indices = @transform_6, window_bounds = array<i64: 1, 128>}, {transform_indices = @transform_7, window_bounds = array<i64: 8, 128>}]} {
    %c0 = arith.constant 0 : index
    %c0_0 = arith.constant 0 : index
    %0 = vector.load %arg1[%c0, %c0_0] : memref<8x32xf32, #tpu.memory_space<vmem>>, vector<8x32xf32>
    %c0_1 = arith.constant 0 : index
    %c0_2 = arith.constant 0 : index
    %1 = vector.load %arg2[%c0_1, %c0_2] : memref<32x128xf32, #tpu.memory_space<vmem>>, vector<32x128xf32>
    %cst = arith.constant dense<0.000000e+00> : vector<8x128xf32>
    %2 = tpu.matmul %0, %1, %cst {dimension_numbers = #tpu.dot_dimension_numbers<[1], [0], [0], [1], [0, 0, 1, 1], [], []>} : vector<8x32xf32>, vector<32x128xf32>, vector<8x128xf32> -> vector<8x128xf32>
    %c0_3 = arith.constant 0 : index
    %c0_4 = arith.constant 0 : index
    %3 = vector.load %arg3[%c0_3, %c0_4] : memref<1x128xf32, #tpu.memory_space<vmem>>, vector<1x128xf32>
    %4 = vector.broadcast %3 : vector<1x128xf32> to vector<8x128xf32>
    %5 = arith.addf %2, %4 : vector<8x128xf32>
    %cst_5 = arith.constant 0.000000e+00 : f32
    %6 = vector.broadcast %cst_5 : f32 to vector<8x128xf32>
    %7 = arith.maximumf %5, %6 : vector<8x128xf32>
    %c0_6 = arith.constant 0 : index
    %c0_7 = arith.constant 0 : index
    %8 = vector.load %arg4[%c0_6, %c0_7] : memref<128x128xf32, #tpu.memory_space<vmem>>, vector<128x128xf32>
    %cst_8 = arith.constant dense<0.000000e+00> : vector<8x128xf32>
    %9 = tpu.matmul %7, %8, %cst_8 {dimension_numbers = #tpu.dot_dimension_numbers<[1], [0], [0], [1], [0, 0, 1, 1], [], []>} : vector<8x128xf32>, vector<128x128xf32>, vector<8x128xf32> -> vector<8x128xf32>
    %c0_9 = arith.constant 0 : index
    %c0_10 = arith.constant 0 : index
    %10 = vector.load %arg5[%c0_9, %c0_10] : memref<1x128xf32, #tpu.memory_space<vmem>>, vector<1x128xf32>
    %11 = vector.broadcast %10 : vector<1x128xf32> to vector<8x128xf32>
    %12 = arith.addf %9, %11 : vector<8x128xf32>
    %cst_11 = arith.constant 0.000000e+00 : f32
    %13 = vector.broadcast %cst_11 : f32 to vector<8x128xf32>
    %14 = arith.maximumf %12, %13 : vector<8x128xf32>
    %c0_12 = arith.constant 0 : index
    %c0_13 = arith.constant 0 : index
    %15 = vector.load %arg6[%c0_12, %c0_13] : memref<128x128xf32, #tpu.memory_space<vmem>>, vector<128x128xf32>
    %cst_14 = arith.constant dense<0.000000e+00> : vector<8x128xf32>
    %16 = tpu.matmul %14, %15, %cst_14 {dimension_numbers = #tpu.dot_dimension_numbers<[1], [0], [0], [1], [0, 0, 1, 1], [], []>} : vector<8x128xf32>, vector<128x128xf32>, vector<8x128xf32> -> vector<8x128xf32>
    %c0_15 = arith.constant 0 : index
    %c0_16 = arith.constant 0 : index
    %17 = vector.load %arg7[%c0_15, %c0_16] : memref<1x128xf32, #tpu.memory_space<vmem>>, vector<1x128xf32>
    %18 = vector.broadcast %17 : vector<1x128xf32> to vector<8x128xf32>
    %19 = arith.addf %16, %18 : vector<8x128xf32>
    %c0_17 = arith.constant 0 : index
    %c0_18 = arith.constant 0 : index
    %20 = vector.load %arg8[%c0_17, %c0_18] : memref<8x128xf32, #tpu.memory_space<vmem>>, vector<8x128xf32>
    tpu.vector_store %arg8[%c0_17, %c0_18], %19 {strides = array<i32>} : memref<8x128xf32, #tpu.memory_space<vmem>>, vector<8x128xf32>,
    return
  }
  func.func @transform_0(%arg0: i32) -> (i32, i32) {
    %c0_i32 = arith.constant 0 : i32
    %c0_i32_0 = arith.constant 0 : i32
    return %arg0, %c0_i32 : i32, i32
  }
  func.func @transform_1(%arg0: i32) -> (i32, i32) {
    %c0_i32 = arith.constant 0 : i32
    %c0_i32_0 = arith.constant 0 : i32
    %c0_i32_1 = arith.constant 0 : i32
    return %c0_i32, %c0_i32_0 : i32, i32
  }
  func.func @transform_2(%arg0: i32) -> (i32, i32) {
    %c0_i32 = arith.constant 0 : i32
    %c0_i32_0 = arith.constant 0 : i32
    %c0_i32_1 = arith.constant 0 : i32
    return %c0_i32, %c0_i32_0 : i32, i32
  }
  func.func @transform_3(%arg0: i32) -> (i32, i32) {
    %c0_i32 = arith.constant 0 : i32
    %c0_i32_0 = arith.constant 0 : i32
    %c0_i32_1 = arith.constant 0 : i32
    return %c0_i32, %c0_i32_0 : i32, i32
  }
  func.func @transform_4(%arg0: i32) -> (i32, i32) {
    %c0_i32 = arith.constant 0 : i32
    %c0_i32_0 = arith.constant 0 : i32
    %c0_i32_1 = arith.constant 0 : i32
    return %c0_i32, %c0_i32_0 : i32, i32
  }
  func.func @transform_5(%arg0: i32) -> (i32, i32) {
    %c0_i32 = arith.constant 0 : i32
    %c0_i32_0 = arith.constant 0 : i32
    %c0_i32_1 = arith.constant 0 : i32
    return %c0_i32, %c0_i32_0 : i32, i32
  }
  func.func @transform_6(%arg0: i32) -> (i32, i32) {
    %c0_i32 = arith.constant 0 : i32
    %c0_i32_0 = arith.constant 0 : i32
    %c0_i32_1 = arith.constant 0 : i32
    return %c0_i32, %c0_i32_0 : i32, i32
  }
  func.func @transform_7(%arg0: i32) -> (i32, i32) {
    %c0_i32 = arith.constant 0 : i32
    %c0_i32_0 = arith.constant 0 : i32
    return %arg0, %c0_i32 : i32, i32
  }
}

</mosaic_0001>

<bundles_post_ra>
// kernel: mlpdr2_forward.1
= control target key start
LH: loop header
LB: loop body
LE: loop exit
PB: predicated region body
PF: predicated region fallthrough
CT: control target
= control target key end

     0   :  { %12 = vsyncpa [#allocation3], 0  ;;  %s1544_s0 = inlined_call_operand.hbm [shape: f32[16,32], index: 0, kind: input, shape index: {}]   ;;  %s1545_s1 = inlined_call_operand.hbm [shape: f32[32,128], index: 1, kind: input, shape index: {}]   ;;  %s1546_s2 = inlined_call_operand.vmem [shape: f32[1,128], index: 2, kind: input, shape index: {}]   ;;  %s1547_s3 = inlined_call_operand.hbm [shape: f32[128,128], index: 3, kind: input, shape index: {}]   ;;  %s1548_s4 = inlined_call_operand.vmem [shape: f32[1,128], index: 4, kind: input, shape index: {}]   ;;  %s1549_s5 = inlined_call_operand.hbm [shape: f32[128,128], index: 5, kind: input, shape index: {}]   ;;  %s1550_s6 = inlined_call_operand.vmem [shape: f32[1,128], index: 6, kind: input, shape index: {}]   ;;  %s1551_s7 = inlined_call_operand.hbm [shape: f32[16,128], index: 7, kind: output, shape index: {}]  }
   0x1   :  { %14 = vsyncpa [#allocation3 + $0x1], 0 }
   0x2   :  { %15 = vsyncpa [#allocation6], 0 }
   0x3   :  { %16 = vsyncpa [#allocation9], 0 }
   0x4   :  { %17 = vsyncpa [#allocation4], 0 }
   0x5   :  { %19 = vsyncpa [#allocation4 + $0x1], 0  ;;  %s1244_s24 = smov 0   ;;  %s1246_s25 = smov 0  }
   0x6   :  { %s1248_s26 = smov 0   ;;  %s1250_s27 = smov 0  }
   0x7 LB: > { %s1265_s28 = sadd.s32 4294967295, %s1192_s27   ;;  %s726_s29 = sadd.s32 4294967294, %s1192_s27   ;;  %s1192_s27 = sphi %s1250_s27, %s1577_s27   ;;  %s1188_s26 = sphi %s1248_s26, %s1576_s26   ;;  %s1184_s25 = sphi %s1246_s25, %s1575_s25   ;;  %s1180_s24 = sphi %s1244_s24, %s1574_s24  }
   0x8   : > { %p45_p0 = scmp.ne.s32.totalorder %s1184_s25, %s1180_s24  ;;  %p1552_p1 = scmp.eq.s32.totalorder %s1265_s28, 0 }
   0x9   : > { %p201_p3 = scmp.eq.s32.totalorder %s726_s29, 1  ;;  %p727_p5 = scmp.ge.s32.totalorder %s1192_s27, 1 }
   0xa   : > { %p1274_p4 = por %p1552_p1, %p45_p0  ;;  %p208_p7 = scmp.lt.s32.totalorder %s1192_s27, 3 }
   0xb   : > { %p1279_p6 = por %p201_p3, %p45_p0  ;;  %s1194_s10 = smov [#allocation5]  }
   0xc   : > { %s1556_s30 = scalar_select %p1274_p4, 1, 0 }
   0xd   : > { %s1557_s8 = scalar_select %p1279_p6, 1, 0 }
   0xe   : > { %p1284_p8 = pnand %p727_p5, %p208_p7  ;;  %s220_s11 = sshll.u32 %s1194_s10, 4  ;;  %s1288_s11 = int_to_ptr.vmem [resolvable:$true] %s220_s11 }
   0xf   : > { %1558 = sst [smem:[#allocation15_spill]] %s1557_s8  ;;  %s1195_s13 = smov [#allocation7]  }
  0x10   : > { %s1559_s9 = scalar_select %p1284_p8, 1, 0 }
  0x11   : > { %p938_p9 = pneg %p1284_p8  ;;  %s236_s14 = sshll.u32 %s1195_s13, 4  ;;  %s1299_s14 = int_to_ptr.vmem [resolvable:$true] %s236_s14 }
  0x12   : > { %s1196_s15 = smov [#allocation8]   ;;  %s1004_s19 = scalar_lea.hbm %s1545_s1, 512 }
  0x13   : > { %p1295_p11 = pnand %p938_p9, %p1552_p1  ;;  %s1301_s16 = sshll.u32 %s1196_s15, 4  ;;  %s253_s16 = int_to_ptr.vmem [resolvable:$true] %s1301_s16 }
  0x14   : > { %p1005_p12 = scmp.ne.s32.totalorder %s1545_s1, %s1004_s19  ;;  %p1011_p5 = scmp.lt.u32.totalorder %s1004_s19, %s1545_s1 }
  0x15   : > { %p1311_p13 = pneg %p1295_p11 }
  0x17   : > { %p1007_p0 = pnand %p1311_p13, %p1005_p12 }
  0x19   : > { %p1008_p3 = pneg %p1007_p0 }
  0x1b   : > { %p1013_p7 = pnand %p1011_p5, %p1008_p3 }
  0x1d   : > { %1016 = shalt.err (!%p1013_p7)
}
  0x1e   : > { %s1017_s10 = scalar_lea.vmem %s1288_s11, 512  ;;  %p1025_p2 = scmp.lt.s32.totalorder %s1288_s11, %s1288_s11 }
  0x1f   : > { %p1018_p9 = scmp.ne.s32.totalorder %s1288_s11, %s1017_s10  ;;  %p1026_p6 = scmp.lt.s32.totalorder %s1017_s10, %s1017_s10 }
  0x21   : > { %p1020_p10 = pnand %p1018_p9, %p1311_p13  ;;  %p1027_p12 = por %p1026_p6, %p1025_p2 }
  0x23   : > { %p1021_p1 = pneg %p1020_p10 }
  0x25   : > { %p1028_p0 = pnand %p1027_p12, %p1021_p1 }
  0x27   : > { %1031 = shalt.err (!%p1028_p0)
}
  0x28   : > { %s1197_s13 = smov 128   ;;  %s1198_s15 = smov 8  }
  0x29   : > { %941 = dma.hbm_to_vmem [thread:$0]  (!%p1295_p11), %s1545_s1, 512, %s1288_s11, [#allocation6], %s1197_s13, %s1197_s13, %s1198_s15  }
  0x2a   : > { %s1032_s21 = scalar_lea.hbm %s1547_s3, 2048 }
  0x2b   : > { %p1033_p1 = scmp.ne.s32.totalorder %s1547_s3, %s1032_s21  ;;  %p1039_p10 = scmp.lt.u32.totalorder %s1032_s21, %s1547_s3 }
  0x2d   : > { %p1035_p2 = pnand %p1033_p1, %p1311_p13 }
  0x2f   : > { %p1036_p6 = pneg %p1035_p2 }
  0x31   : > { %p1041_p3 = pnand %p1039_p10, %p1036_p6 }
  0x33   : > { %1044 = shalt.err (!%p1041_p3)
}
  0x34   : > { %s1045_s11 = scalar_lea.vmem %s1299_s14, 2048  ;;  %p1053_p12 = scmp.lt.s32.totalorder %s1299_s14, %s1299_s14 }
  0x35   : > { %p1046_p5 = scmp.ne.s32.totalorder %s1299_s14, %s1045_s11  ;;  %p1054_p0 = scmp.lt.s32.totalorder %s1045_s11, %s1045_s11 }
  0x37   : > { %p1048_p7 = pnand %p1046_p5, %p1311_p13  ;;  %p1055_p1 = por %p1054_p0, %p1053_p12 }
  0x39   : > { %p1049_p9 = pneg %p1048_p7 }
  0x3b   : > { %p1056_p2 = pnand %p1055_p1, %p1049_p9 }
  0x3d   : > { %1059 = shalt.err (!%p1056_p2)
}
  0x3e   : > { %944 = dma.hbm_to_vmem [thread:$0]  (!%p1295_p11), %s1547_s3, 2048, %s1299_s14, [#allocation6], %s1197_s13, %s1197_s13, %s1198_s15  }
  0x3f   : > { %s1060_s20 = scalar_lea.hbm %s1549_s5, 2048 }
  0x40   : > { %p1061_p6 = scmp.ne.s32.totalorder %s1549_s5, %s1060_s20  ;;  %p1067_p5 = scmp.lt.u32.totalorder %s1060_s20, %s1549_s5 }
  0x42   : > { %p1063_p10 = pnand %p1061_p6, %p1311_p13 }
  0x44   : > { %p1064_p3 = pneg %p1063_p10 }
  0x46   : > { %p1069_p7 = pnand %p1067_p5, %p1064_p3 }
  0x48   : > { %1072 = shalt.err (!%p1069_p7)
}
  0x49   : > { %s1073_s11 = scalar_lea.vmem %s253_s16, 2048  ;;  %p1081_p1 = scmp.lt.s32.totalorder %s253_s16, %s253_s16 }
  0x4a   : > { %p1074_p9 = scmp.ne.s32.totalorder %s253_s16, %s1073_s11  ;;  %p1082_p2 = scmp.lt.s32.totalorder %s1073_s11, %s1073_s11 }
  0x4c   : > { %p1076_p12 = pnand %p1074_p9, %p1311_p13  ;;  %p1083_p4 = por %p1082_p2, %p1081_p1 }
  0x4e   : > { %p1077_p0 = pneg %p1076_p12 }
  0x50   : > { %p1084_p8 = pnand %p1083_p4, %p1077_p0 }
  0x52   : > { %1087 = shalt.err (!%p1084_p8)
}
  0x53   : > { %947 = dma.hbm_to_vmem [thread:$0]  (!%p1295_p11), %s1549_s5, 2048, %s253_s16, [#allocation9], %s1197_s13, %s1197_s13, %s1198_s15  }
  0x54   : > { %s1384_s22 = sadd.s32 1, %s1192_s27   ;;  %s32_s17 = sadd.s32 1, %s1188_s26 }
  0x55   : > { %s29_s12 = ssub.s32 %s1192_s27, %s1384_s22  ;;  %p39_p8 = scmp.ne.s32.totalorder %s1188_s26, %s1184_s25 }
  0x56   : > { %p30_p4 = scmp.eq.s32.totalorder %s29_s12, 0  ;;  %p40_p13 = scmp.eq.s32.totalorder %s1192_s27, 0 }
  0x57   : > { %p959_p6 = scmp.lt.s32.totalorder %s1192_s27, 2  ;;  %p1562_p3 = scmp.eq.s32.totalorder %s1265_s28, 1 }
  0x58   : > { %s1394_s18 = scalar_select %p30_p4, %s1188_s26, %s32_s17  }
  0x59   : > { %p41_p10 = por %p40_p13, %p39_p8  ;;  %p1398_p5 = por %p1562_p3, %p39_p8 }
  0x5a   : > { %s269_s20 = sand.u32 1, %s1188_s26   ;;  %s733_s21 = sshll.u32 %s1192_s27, 7 }
  0x5b   : > { %s732_s16 = sshll.u32 %s269_s20, 3  ;;  %s1407_s23 = scalar_lea.hbm %s1544_s0, %s733_s21 }
  0x5c   : > { %s273_s29 = scalar_lea.vmem [#allocation2], %s732_s16  ;;  %p1409_p11 = pnand %p959_p6, %p41_p10 }
  0x5d   : > { %s280_s10 = sshll.u32 %s273_s29, 4  ;;  %s270_s14 = scalar_lea.sflag [#allocation3], %s269_s20  ;;  %s1413_s10 = int_to_ptr.vmem [resolvable:$true] %s280_s10 }
  0x5e   : > { %s1088_s8 = scalar_lea.hbm %s1407_s23, 128  ;;  %p1090_p9 = pneg %p1409_p11 }
  0x5f   : > { %p1089_p7 = scmp.ne.s32.totalorder %s1407_s23, %s1088_s8  ;;  %s1093_s21 = scalar_lea.hbm %s1544_s0, 256 }
  0x60   : > { %p1094_p1 = scmp.lt.u32.totalorder %s1407_s23, %s1544_s0  ;;  %p1095_p2 = scmp.lt.u32.totalorder %s1093_s21, %s1088_s8 }
  0x61   : > { %p1091_p12 = pnand %p1090_p9, %p1089_p7  ;;  %p1097_p8 = scmp.lt.u32.totalorder %s1088_s8, %s1407_s23 }
  0x62   : > { %p1096_p4 = por %p1095_p2, %p1094_p1 }
  0x63   : > { %p1092_p0 = pneg %p1091_p12 }
  0x64   : > { %p1098_p13 = por %p1097_p8, %p1096_p4 }
  0x66   : > { %p1099_p6 = pnand %p1098_p13, %p1092_p0 }
  0x68   : > { %1102 = shalt.err (!%p1099_p6)
}
  0x69   : > { %s1103_s20 = scalar_lea.vmem %s1413_s10, 128  ;;  %s1199_s15 = smov [#allocation2]  }
  0x6a   : > { %p1104_p10 = scmp.ne.s32.totalorder %s1413_s10, %s1103_s20  ;;  %s1108_s29 = sshll.u32 %s1199_s15, 4  ;;  %s1109_s29 = int_to_ptr.vmem [resolvable:$false] %s1108_s29 }
  0x6b   : > { %s1110_s12 = scalar_lea.vmem %s1109_s29, 256  ;;  %p1111_p12 = scmp.lt.s32.totalorder %s1413_s10, %s1109_s29 }
  0x6c   : > { %p1106_p3 = pnand %p1104_p10, %p1090_p9  ;;  %p1112_p1 = scmp.lt.s32.totalorder %s1110_s12, %s1103_s20 }
  0x6e   : > { %p1107_p7 = pneg %p1106_p3  ;;  %p1113_p2 = por %p1112_p1, %p1111_p12 }
  0x70   : > { %p1114_p4 = pnand %p1113_p2, %p1107_p7 }
  0x72   : > { %1117 = shalt.err (!%p1114_p4)
}
  0x73   : > { %951 = dma.hbm_to_vmem [thread:$0]  (!%p1409_p11), %s1407_s23, 128, %s1413_s10, %s270_s14  }
  0x74   : > { %p1565_p0 = scmp.ne.s32.totalorder %s1559_s9, 0 }
  0x75   : > { %s1443_s8 = sand.u32 (!%p1565_p0), 1, %s1184_s25   ;;  %p1566_p9 = scmp.ne.s32.totalorder (!%p1565_p0), %s1556_s30, 0 }
  0x76   : > { %289 = sbr.rel (%p1565_p0) target bundleno = 804 (0x324), region = 48  ;;  %s735_s17 = sshll.u32 (!%p1565_p0), %s1443_s8, 3 }
  0x77   : > { %s292_s21 = scalar_lea.sflag (!%p1565_p0), [#allocation3], %s1443_s8  ;;  %s1449_s16 = scalar_lea.vmem (!%p1565_p0), [#allocation2], %s735_s17 }
  0x7d   : > { %1163 = dma.done.wait (%p1566_p9), %s292_s21, 128  }
  0x7e   : > { %1165 = vsyncadd (%p1566_p9), %s292_s21, 4294967168  ;;  %p1567_p11 = scmp.eq.s32.totalorder %s1265_s28, 0 }
  0x80   : > { %1167 = dma.done.wait (%p1567_p11), [#allocation6], 2560   ;;  %p1568_p8 = pmov %p1567_p11 }
  0x82   : > { %1169 = vsyncadd (%p1568_p8), [#allocation6], 4294964736  ;;  %p1569_p13 = pmov %p1568_p8 }
  0x83   : > { %p1570_p6 = pmov %p1568_p8 }
  0x84   : > { %1171 = dma.done.wait (%p1569_p13), [#allocation9], 2048  }
  0x85   : > { %1173 = vsyncadd (%p1570_p6), [#allocation9], 4294965248  ;;  %v1200_v0 = vmov 0.0|0.0   ;;  %vm1201_vm0 = vmmov 0   ;;  %v1202_v1 = vmov 0.0   ;;  %v339_v2 = vld [vmem:[#allocation5] sm:$0xff] }
  0x86   : > { %868 = vmatprep.subr.bf16.mxu0 %v1200_v0  ;;  %795 = vmatprep.mubr.msk.f32.mxu0 %vm1201_vm0, %v1202_v1  ;;  %v340_v3 = vld [vmem:[#allocation5 + $0x8] sm:$0xff]  ;;  %v341_v4 = vld [vmem:[#allocation5 + $0x10] sm:$0xff]  ;;  %v342_v6 = vld [vmem:[#allocation5 + $0x18] sm:$0xff]  ;;  %vm350_vm1 = vcmask 261120   ;;  %s745_s13 = sshll.u32 %s1265_s28, 7  ;;  %s337_s20 = scalar_lea.vmem [#allocation10], %s735_s17 }
  0x87   : > { %874 = vmatprep.subr.bf16.mxu1 %v1200_v0  ;;  %830 = vmatprep.mubr.msk.f32.mxu1 %vm1201_vm0, %v1202_v1  ;;  %v869_v5 = vpack.c.bf16 %v340_v3, %v339_v2  ;;  %v425_v7 = vld [vmem:[#allocation7] sm:$0xff]  ;;  %v426_v8 = vld [vmem:[#allocation7 + $0x8] sm:$0xff]  ;;  %v427_v9 = vld [vmem:[#allocation7 + $0x10] sm:$0xff]  ;;  %v872_v11 = vpack.c.bf16 %v342_v6, %v341_v4  ;;  %s627_s15 = sshll.u32 %s337_s20, 4  ;;  %s1500_s21 = scalar_lea.hbm %s1551_s7, %s745_s13  ;;  %s1502_s15 = int_to_ptr.vmem [resolvable:$true] %s627_s15 }
  0x88   : > { %v428_v10 = vld [vmem:[#allocation7 + $0x18] sm:$0xff]  ;;  %v875_v12 = vpack.c.bf16 %v426_v8, %v425_v7  ;;  %v429_v14 = vld [vmem:[#allocation7 + $0x20] sm:$0xff]  ;;  %v430_v15 = vld [vmem:[#allocation7 + $0x28] sm:$0xff]  ;;  %s1118_s30 = scalar_lea.vmem %s1502_s15, 128  ;;  %s1203_s28 = smov [#allocation10]  }
  0x89   : > { %870 = vmatpush3.bf16.msra.mxu0 %v869_v5  ;;  %v878_v13 = vpack.c.bf16 %v428_v10, %v427_v9  ;;  %v338_v16 = vld [vmem:[%s1449_s16] sm:$0xff]  ;;  %v881_v17 = vpack.c.bf16 %v430_v15, %v429_v14  ;;  %v433_v21 = vld [vmem:[#allocation7 + $0x40] sm:$0xff]  ;;  %v434_v22 = vld [vmem:[#allocation7 + $0x48] sm:$0xff]  ;;  %s614_s16 = scalar_lea.sflag [#allocation4], %s1443_s8  ;;  %p1119_p10 = scmp.ne.s32.totalorder %s1502_s15, %s1118_s30 }
  0x8a   : > { %871 = vmatprep.subr.bf16.mxu0 %v1200_v0  ;;  %876 = vmatpush3.bf16.msra.mxu1 %v875_v12  ;;  %v431_v18 = vld [vmem:[#allocation7 + $0x30] sm:$0xff]  ;;  %v432_v19 = vld [vmem:[#allocation7 + $0x38] sm:$0xff]  ;;  %v887_v23 = vpack.c.bf16 %v434_v22, %v433_v21  ;;  %v437_v27 = vld [vmem:[#allocation7 + $0x60] sm:$0xff]  ;;  %s1122_s17 = sshll.u32 %s1203_s28, 4  ;;  %s1123_s17 = int_to_ptr.vmem [resolvable:$false] %s1122_s17 }
  0x8b   : > { %877 = vmatprep.subr.bf16.mxu1 %v1200_v0  ;;  %v884_v20 = vpack.c.bf16 %v432_v19, %v431_v18  ;;  %v435_v24 = vld [vmem:[#allocation7 + $0x50] sm:$0xff]  ;;  %v436_v25 = vld [vmem:[#allocation7 + $0x58] sm:$0xff]  ;;  %v438_v28 = vld [vmem:[#allocation7 + $0x68] sm:$0xff]  ;;  %p1120_p3 = pnand %p1119_p10, %p1398_p5  ;;  %s1124_s9 = scalar_lea.vmem %s1123_s17, 256 }
  0x8c   : > { %v890_v26 = vpack.c.bf16 %v436_v25, %v435_v24  ;;  %v893_v29 = vpack.c.bf16 %v438_v28, %v437_v27  ;;  %v439_v30 = vld [vmem:[#allocation7 + $0x70] sm:$0xff]  ;;  %v440_v31 = vld [vmem:[#allocation7 + $0x78] sm:$0xff]  ;;  %v519_v33 = vld [vmem:[#allocation8] sm:$0xff]  ;;  %p1125_p12 = scmp.lt.s32.totalorder %s1502_s15, %s1123_s17  ;;  %p1126_p1 = scmp.lt.s32.totalorder %s1124_s9, %s1118_s30 }
  0x8d   : > { %873 = vmatpush3.bf16.msra.mxu0 %v872_v11  ;;  %v896_v32 = vpack.c.bf16 %v440_v31, %v439_v30  ;;  %v520_v34 = vld [vmem:[#allocation8 + $0x8] sm:$0xff]  ;;  %v521_v35 = vld [vmem:[#allocation8 + $0x10] sm:$0xff]  ;;  %v522_v37 = vld [vmem:[#allocation8 + $0x18] sm:$0xff]  ;;  %p1121_p7 = pneg %p1120_p3 }
  0x8e   : > { %898 = vmatprep.subr.bf16.mxu0 %v1200_v0  ;;  %879 = vmatpush3.bf16.msra.mxu1 %v878_v13  ;;  %v899_v36 = vpack.c.bf16 %v520_v34, %v519_v33  ;;  %v902_v38 = vpack.c.bf16 %v522_v37, %v521_v35  ;;  %v523_v39 = vld [vmem:[#allocation8 + $0x20] sm:$0xff]  ;;  %v524_v40 = vld [vmem:[#allocation8 + $0x28] sm:$0xff]  ;;  %v525_v42 = vld [vmem:[#allocation8 + $0x30] sm:$0xff]  ;;  %p1127_p2 = por %p1126_p1, %p1125_p12 }
  0x8f   : > { %880 = vmatprep.subr.bf16.mxu1 %v1200_v0  ;;  %v905_v41 = vpack.c.bf16 %v524_v40, %v523_v39  ;;  %v526_v43 = vld [vmem:[#allocation8 + $0x38] sm:$0xff]  ;;  %v527_v45 = vld [vmem:[#allocation8 + $0x40] sm:$0xff]  ;;  %v528_v46 = vld [vmem:[#allocation8 + $0x48] sm:$0xff] }
  0x90   : > { %796 = vmatmul.mubr.msk.f32.vlgmr.msra.gmra.mrb[0].mxu0 %vm350_vm1, %v338_v16  ;;  %v908_v44 = vpack.c.bf16 %v526_v43, %v525_v42  ;;  %v911_v47 = vpack.c.bf16 %v528_v46, %v527_v45  ;;  %v529_v48 = vld [vmem:[#allocation8 + $0x50] sm:$0xff]  ;;  %v530_v49 = vld [vmem:[#allocation8 + $0x58] sm:$0xff]  ;;  %v531_v51 = vld [vmem:[#allocation8 + $0x60] sm:$0xff]  ;;  %p1128_p4 = pnand %p1127_p2, %p1121_p7 }
  0x91   : > { %865 = vmatprep.mubr.msk.f32.mxu0 %vm1201_vm0, %v1202_v1  ;;  %900 = vmatpush3.bf16.msra.mxu0 %v899_v36  ;;  %v914_v50 = vpack.c.bf16 %v530_v49, %v529_v48  ;;  %v532_v52 = vld [vmem:[#allocation8 + $0x68] sm:$0xff]  ;;  %v740_v54 = vld [vmem:[%s1546_s2] ss:$0 sm:$0xff]  ;;  %v534_v60 = vld [vmem:[#allocation8 + $0x78] sm:$0xff] }
  0x92   : > { %882 = vmatpush3.bf16.msra.mxu1 %v881_v17  ;;  %901 = vmatprep.subr.bf16.mxu0 %v1200_v0  ;;  %v917_v53 = vpack.c.bf16 %v532_v52, %v531_v51  ;;  %v533_v59 = vld [vmem:[#allocation8 + $0x70] sm:$0xff] }
  0x93   : > { %883 = vmatprep.subr.bf16.mxu1 %v1200_v0  ;;  %v920_v61 = vpack.c.bf16 %v534_v60, %v533_v59  ;;  %v742_v62 = vld [vmem:[%s1548_s4] ss:$0 sm:$0xff] }
  0x94   : > { %v743_v3 = vld [vmem:[%s1550_s6] ss:$0 sm:$0xff] }
  0x95   : > { %903 = vmatpush3.bf16.msra.mxu0 %v902_v38 }
  0x96   : > { %885 = vmatpush3.bf16.msra.mxu1 %v884_v20  ;;  %904 = vmatprep.subr.bf16.mxu0 %v1200_v0 }
  0x97   : > { %886 = vmatprep.subr.bf16.mxu1 %v1200_v0 }
  0x99   : > { %906 = vmatpush3.bf16.msra.mxu0 %v905_v41 }
  0x9a   : > { %888 = vmatpush3.bf16.msra.mxu1 %v887_v23  ;;  %907 = vmatprep.subr.bf16.mxu0 %v1200_v0 }
  0x9b   : > { %889 = vmatprep.subr.bf16.mxu1 %v1200_v0 }
  0x9d   : > { %909 = vmatpush3.bf16.msra.mxu0 %v908_v44 }
  0x9e   : > { %891 = vmatpush3.bf16.msra.mxu1 %v890_v26  ;;  %910 = vmatprep.subr.bf16.mxu0 %v1200_v0 }
  0x9f   : > { %892 = vmatprep.subr.bf16.mxu1 %v1200_v0 }
  0xa1   : > { %912 = vmatpush3.bf16.msra.mxu0 %v911_v47 }
  0xa2   : > { %894 = vmatpush3.bf16.msra.mxu1 %v893_v29  ;;  %913 = vmatprep.subr.bf16.mxu0 %v1200_v0 }
  0xa3   : > { %895 = vmatprep.subr.bf16.mxu1 %v1200_v0 }
  0xa5   : > { %915 = vmatpush3.bf16.msra.mxu0 %v914_v50 }
  0xa6   : > { %897 = vmatpush3.bf16.msra.mxu1 %v896_v32  ;;  %916 = vmatprep.subr.bf16.mxu0 %v1200_v0 }
  0xa9   : > { %918 = vmatpush3.bf16.msra.mxu0 %v917_v53 }
  0xaa   : > { %919 = vmatprep.subr.bf16.mxu0 %v1200_v0 }
  0xad   : > { %921 = vmatpush3.bf16.msra.mxu0 %v920_v61 }
 0x163   : > { %v420_v55 = vpop.f32.mrb[0].mxu0 }
 0x164   : > { %v421_v56 = vadd.f32 %v740_v54, %v420_v55  ;;  %v797_v57 = vpop.f32.mrb[1].mxu0 }
 0x166   : > { %v424_v58 = vmax.f32 %v421_v56, 0.0 }
 0x168   : > { %831 = vmatmul.mubr.f32.vlgmr.msra.gmra.mrb[0].mxu1 %v424_v58 }
 0x23b   : > { %v514_v63 = vpop.f32.mrb[0].mxu1 }
 0x23c   : > { %v515_v0 = vadd.f32 %v742_v62, %v514_v63  ;;  %v832_v1 = vpop.f32.mrb[1].mxu1 }
 0x23e   : > { %v518_v2 = vmax.f32 %v515_v0, 0.0 }
 0x240   : > { %866 = vmatmul.mubr.f32.vlgmr.msra.gmra.mrb[2].mxu0 %v518_v2 }
 0x313   : > { %v608_v4 = vpop.f32.mrb[2].mxu0 }
 0x314   : > { %v609_v5 = vadd.f32 %v743_v3, %v608_v4  ;;  %v867_v6 = vpop.f32.mrb[3].mxu0 }
 0x316   : > { %612 = vst [vmem:[%s337_s20] sm:$0xff] %v609_v5 }
 0x317   : > { %1131 = shalt.err (!%p1128_p4)
}
 0x318   : > { %s1132_s8 = scalar_lea.hbm %s1500_s21, 128  ;;  %s1136_s11 = scalar_lea.hbm %s1551_s7, 256 }
 0x319   : > { %p1133_p0 = scmp.ne.s32.totalorder %s1500_s21, %s1132_s8  ;;  %p1137_p8 = scmp.lt.u32.totalorder %s1500_s21, %s1551_s7 }
 0x31a   : > { %p1138_p13 = scmp.lt.u32.totalorder %s1136_s11, %s1132_s8  ;;  %p1140_p10 = scmp.lt.u32.totalorder %s1132_s8, %s1500_s21 }
 0x31b   : > { %p1134_p9 = pnand %p1133_p0, %p1398_p5 }
 0x31c   : > { %p1139_p6 = por %p1138_p13, %p1137_p8 }
 0x31d   : > { %p1135_p11 = pneg %p1134_p9 }
 0x31e   : > { %p1141_p3 = por %p1140_p10, %p1139_p6 }
 0x320   : > { %p1142_p7 = pnand %p1141_p3, %p1135_p11 }
 0x322   : > { %1145 = shalt.err (!%p1142_p7)
}
 0x323   : > { %936 = dma.vmem_to_hbm [thread:$0]  (%p1398_p5), %s1502_s15, 128, %s1500_s21, %s614_s16  }
 0x324 PF: > { %s1571_s20 = sld [smem:[#allocation15_spill]]  ;;  %s639_s29 = sand.u32 1, %s1180_s24  }
 0x325   : > { %p1573_p1 = scmp.ge.s32.totalorder %s1192_s27, 2  ;;  %s640_s12 = scalar_lea.sflag [#allocation4], %s639_s29 }
 0x32a   : > { %p1572_p12 = scmp.ne.s32.totalorder %s1571_s20, 0 }
 0x32c   : > { %p953_p2 = pnand %p1573_p1, %p1572_p12 }
 0x32e   : > { %1175 = dma.done.wait (!%p953_p2), %s640_s12, 128  }
 0x32f   : > { %1177 = vsyncadd (!%p953_p2), %s640_s12, 4294967168  ;;  %p22_p4 = scmp.ge.s32.totalorder %s1384_s22, 4   ;;  %s1574_s24 = smov %s1184_s25 }
 0x330   : > { %s1575_s25 = smov %s1188_s26  ;;  %s1576_s26 = smov %s1394_s18 }
 0x331   : > { %s1577_s27 = smov %s1384_s22  ;;  %24 = sbr.rel (!%p22_p4) target bundleno = 7 (0x7), region = 105 }
 0x338   :  { %645 = vsyncpa [#allocation3], 1 }
 0x339   :  { %647 = vsyncpa [#allocation3 + $0x1], 1 }
 0x33a   :  { %648 = vsyncpa [#allocation6], 1 }
 0x33b   :  { %649 = vsyncpa [#allocation9], 1 }
 0x33c   :  { %650 = vsyncpa [#allocation4], 1 }
 0x33d   :  { %652 = vsyncpa [#allocation4 + $0x1], 1 }

</bundles_post_ra>
